<compile_context>
chip_gen: v7x
topology: tpu7x:2x2x1
jax: 0.10.0
libtpu: 0.0.40
codegen_flags: <defaults>
</compile_context>

<pallas_src>
import jax
import jax.numpy as jnp
import numpy as np
from jax.experimental import pallas as pl
from jax.experimental.pallas import tpu as pltpu


# ----------------------------------------------------------------------------
# Fused kernel: RNN decoder steps + output projection + masked log-softmax
#               + target gather + masked sum over time  ->  (1, 128) traj log-prob
# ----------------------------------------------------------------------------
def pg_fused_kernel(obs_ref, h0_ref, wx_ref, wh_ref, b_ref, wout_ref, bout_ref,
                    vmask_ref, tgt_id_ref, tgt_mask_ref, out_ref):
    TB, D = obs_ref.shape            # T*Bp time-major rows (row = t*Bp + b), Bp = 8-padded batch
    Bp, H = h0_ref.shape
    T = TB // Bp
    A = wout_ref.shape[1]
    OUT_LANES = out_ref.shape[1]     # 128 (lane-dense output block)

    # Hoisted input projection: one matmul covering all time steps (+ bias).
    pre_x = (jnp.dot(obs_ref[...], wx_ref[...], preferred_element_type=jnp.float32)
             + b_ref[...])                                            # (T*Bp, H)

    # Serial recurrence, fully unrolled (static T). Wh is loaded once and stays resident;
    # hidden states stay in vregs (no VMEM round trip).
    wh = wh_ref[...]
    h = h0_ref[...]                                                   # (Bp, H)
    h_steps = []
    for t in range(T):
        h = jnp.tanh(pre_x[t * Bp:(t + 1) * Bp, :]                    # aligned 8-row slice
                     + jnp.dot(h, wh, preferred_element_type=jnp.float32))
        h_steps.append(h)
    h_all = jnp.concatenate(h_steps, axis=0)                          # (T*Bp, H), in vregs

    # Batched output projection: one MXU push -> lane-dense (T*Bp, A) logits slab.
    logits = (jnp.dot(h_all, wout_ref[...], preferred_element_type=jnp.float32)
              + bout_ref[...])                                        # (T*Bp, A)

    # masked log-softmax over actions (f32 math; -1e30 sentinel). Only the target column of
    # log_probs is ever needed, so the full log_probs slab is never materialized.
    # NOTE: fully-masked / padded rows are neutralized by tgt_action_mask == 0.
    masked = jnp.where(vmask_ref[...] > 0.0, logits, jnp.float32(-1e30))
    m = jnp.max(masked, axis=-1, keepdims=True)
    lse = m + jnp.log(jnp.sum(jnp.exp(masked - m), axis=-1, keepdims=True))   # (T*Bp, 1)

    # Gather the target action's masked logit per (t,b) row, subtract lse, apply step mask.
    a_ids = jax.lax.broadcasted_iota(jnp.int32, (TB, A), 1)
    onehot = (a_ids == tgt_id_ref[...]).astype(jnp.float32)           # (T*Bp, A)
    tgt_logit = jnp.sum(masked * onehot, axis=-1, keepdims=True)      # (T*Bp, 1)
    tgt_logp = (tgt_logit - lse) * tgt_mask_ref[...]                  # (T*Bp, 1)

    # Sum over time per trajectory into a lane-dense (1, 128) block: rows are t*Bp + b,
    # select lane b where (row % Bp == b); lanes >= Bp stay zero.
    row_ids = jax.lax.broadcasted_iota(jnp.int32, (TB, OUT_LANES), 0)
    col_ids = jax.lax.broadcasted_iota(jnp.int32, (TB, OUT_LANES), 1)
    sel = (row_ids % Bp == col_ids).astype(jnp.float32)               # (T*Bp, 128)
    out_ref[...] = jnp.sum(tgt_logp * sel, axis=0, keepdims=True)     # (1, 128)


# ----------------------------------------------------------------------------
# PGAgent.forward / compute_trajectory_actions_prob wrapper
# ----------------------------------------------------------------------------
def pg_agent_forward(obs_emb, h0, params, valid_action_mask, tgt_action_id, tgt_action_mask):
    """obs_emb: (T,B,D) time-major step inputs; masks/ids in (B,T,...) like the PyTorch module."""
    wx, wh, b, wout, bout = params
    T, B, D = obs_emb.shape
    H = wh.shape[0]
    A = wout.shape[1]

    # Pad batch to the f32 sublane quantum so all per-step slices / vreg ops are 8-aligned.
    Bp = max(8, ((B + 7) // 8) * 8)
    pad = Bp - B
    TB = T * Bp
    OUT_LANES = 128                                  # lane-dense output block width

    obs_p = jnp.pad(obs_emb, ((0, 0), (0, pad), (0, 0)))
    h0_p = jnp.pad(h0, ((0, pad), (0, 0)))

    # Time-major flat layouts matching the in-kernel row order (row = t*Bp + b). These tensors
    # are tiny (~30 KB total); the large (T,Bp,A) logits never leave VMEM.
    obs_flat = obs_p.reshape(TB, D)
    vmask_tm = jnp.pad(jnp.transpose(valid_action_mask, (1, 0, 2)),
                       ((0, 0), (0, pad), (0, 0))).reshape(TB, A).astype(jnp.float32)
    tgt_id_tm = jnp.pad(jnp.transpose(tgt_action_id, (1, 0)),
                        ((0, 0), (0, pad))).reshape(TB, 1).astype(jnp.int32)
    tgt_mask_tm = jnp.pad(jnp.transpose(tgt_action_mask, (1, 0)),
                          ((0, 0), (0, pad))).reshape(TB, 1).astype(jnp.float32)

    out = pl.pallas_call(
        pg_fused_kernel,
        out_shape=jax.ShapeDtypeStruct((1, OUT_LANES), jnp.float32),
        grid_spec=pltpu.PrefetchScalarGridSpec(
            num_scalar_prefetch=0,
            grid=(1,),
            in_specs=[
                pl.BlockSpec((TB, D), lambda i: (0, 0)),          # obs (time-major flat)
                pl.BlockSpec((Bp, H), lambda i: (0, 0)),          # h0 (padded)
                pl.BlockSpec((D, H), lambda i: (0, 0)),           # W_x
                pl.BlockSpec((H, H), lambda i: (0, 0)),           # W_h
                pl.BlockSpec((1, H), lambda i: (0, 0)),           # b
                pl.BlockSpec((H, A), lambda i: (0, 0)),           # W_out
                pl.BlockSpec((1, A), lambda i: (0, 0)),           # b_out
                pl.BlockSpec((TB, A), lambda i: (0, 0)),          # valid_action_mask (f32)
                pl.BlockSpec((TB, 1), lambda i: (0, 0)),          # tgt_action_id
                pl.BlockSpec((TB, 1), lambda i: (0, 0)),          # tgt_action_mask
            ],
            out_specs=pl.BlockSpec((1, OUT_LANES), lambda i: (0, 0)),
        ),
        compiler_params=pltpu.CompilerParams(dimension_semantics=("arbitrary",)),
    )(obs_flat, h0_p, wx, wh, b, wout, bout, vmask_tm, tgt_id_tm, tgt_mask_tm)
    return out[0, :B]                                               # (B,)


# ----------------------------------------------------------------------------
# Pure-JAX reference (same math) for a sanity check
# ----------------------------------------------------------------------------
def reference_forward(obs_emb, h0, params, vmask, tgt_id, tgt_mask):
    wx, wh, b, wout, bout = params
    T = obs_emb.shape[0]
    h = h0
    logits_list = []
    for t in range(T):
        h = jnp.tanh(obs_emb[t] @ wx + h @ wh + b[0])
        logits_list.append(h @ wout + bout[0])
    logits = jnp.transpose(jnp.stack(logits_list, axis=0), (1, 0, 2))
    masked = jnp.where(vmask > 0, logits, jnp.float32(-1e30))
    logp = jax.nn.log_softmax(masked, axis=-1)
    tgt_lp = jnp.take_along_axis(logp, tgt_id[..., None], axis=-1)[..., 0] * tgt_mask
    return tgt_lp.sum(-1)


if __name__ == "__main__":
    B, T, D, H, A = 2, 8, 32, 32, 128   # batch, time steps, obs dim, hidden, memory_size/actions

    key = jax.random.PRNGKey(0)
    ks = jax.random.split(key, 10)

    obs_emb = jax.random.normal(ks[0], (T, B, D), dtype=jnp.float32) * 0.5
    h0 = jax.random.normal(ks[1], (B, H), dtype=jnp.float32) * 0.1

    wx = jax.random.normal(ks[2], (D, H), dtype=jnp.float32) * 0.2
    wh = jax.random.normal(ks[3], (H, H), dtype=jnp.float32) * 0.2
    b = jax.random.normal(ks[4], (1, H), dtype=jnp.float32) * 0.1
    wout = jax.random.normal(ks[5], (H, A), dtype=jnp.float32) * 0.2
    bout = jax.random.normal(ks[6], (1, A), dtype=jnp.float32) * 0.1
    params = (wx, wh, b, wout, bout)

    # valid_action_mask: random, with action 0 always valid per (b, t)
    vmask = (jax.random.uniform(ks[7], (B, T, A)) < 0.7).astype(jnp.float32)
    vmask = vmask.at[:, :, 0].set(1.0)

    # tgt_action_id: a valid action per (b, t)
    scores = jax.random.uniform(ks[8], (B, T, A)) * vmask
    tgt_id = jnp.argmax(scores, axis=-1).astype(jnp.int32)          # (B, T)

    # tgt_action_mask: trajectory lengths 8 and 5
    lengths = jnp.array([8, 5])
    tgt_mask = (jnp.arange(T)[None, :] < lengths[:, None]).astype(jnp.float32)

    out = pg_agent_forward(obs_emb, h0, params, vmask, tgt_id, tgt_mask)
    out = jax.block_until_ready(out)

    ref = reference_forward(obs_emb, h0, params, vmask, tgt_id, tgt_mask)
    np.testing.assert_allclose(np.asarray(out), np.asarray(ref), rtol=1e-4, atol=1e-4)

    # TODO(synk): the BERT encoder and the environment/beam-search control flow of
    # PGAgent (sample/new_beam_search) are host-side Python logic, not kernel work.
    print("KERNEL_OK")
</pallas_src>

<mosaic_0001>
module attributes {stable_mosaic.version = 11 : i64} {
  func.func @pg_fused_kernel(%arg0: i32, %arg1: memref<64x32xf32, #tpu.memory_space<vmem>>, %arg2: memref<8x32xf32, #tpu.memory_space<vmem>>, %arg3: memref<32x32xf32, #tpu.memory_space<vmem>>, %arg4: memref<32x32xf32, #tpu.memory_space<vmem>>, %arg5: memref<1x32xf32, #tpu.memory_space<vmem>>, %arg6: memref<32x128xf32, #tpu.memory_space<vmem>>, %arg7: memref<1x128xf32, #tpu.memory_space<vmem>>, %arg8: memref<64x128xf32, #tpu.memory_space<vmem>>, %arg9: memref<64x1xi32, #tpu.memory_space<vmem>>, %arg10: memref<64x1xf32, #tpu.memory_space<vmem>>, %arg11: memref<1x128xf32, #tpu.memory_space<vmem>>) attributes {dimension_semantics = [#tpu.dimension_semantics<arbitrary>], iteration_bounds = array<i64: 1>, scalar_prefetch = 0 : i64, scratch_operands = 0 : i64, tpu.core_type = #tpu.core_type<tc>, window_params = [{pipeline_mode = #tpu.pipeline_mode<synchronous>, transform_indices = @transform_0, window_bounds = array<i64: 64, 32>}, {pipeline_mode = #tpu.pipeline_mode<synchronous>, transform_indices = @transform_1, window_bounds = array<i64: 8, 32>}, {pipeline_mode = #tpu.pipeline_mode<synchronous>, transform_indices = @transform_2, window_bounds = array<i64: 32, 32>}, {pipeline_mode = #tpu.pipeline_mode<synchronous>, transform_indices = @transform_3, window_bounds = array<i64: 32, 32>}, {pipeline_mode = #tpu.pipeline_mode<synchronous>, transform_indices = @transform_4, window_bounds = array<i64: 1, 32>}, {pipeline_mode = #tpu.pipeline_mode<synchronous>, transform_indices = @transform_5, window_bounds = array<i64: 32, 128>}, {pipeline_mode = #tpu.pipeline_mode<synchronous>, transform_indices = @transform_6, window_bounds = array<i64: 1, 128>}, {pipeline_mode = #tpu.pipeline_mode<synchronous>, transform_indices = @transform_7, window_bounds = array<i64: 64, 128>}, {pipeline_mode = #tpu.pipeline_mode<synchronous>, transform_indices = @transform_8, window_bounds = array<i64: 64, 1>}, {pipeline_mode = #tpu.pipeline_mode<synchronous>, transform_indices = @transform_9, window_bounds = array<i64: 64, 1>}, {pipeline_mode = #tpu.pipeline_mode<synchronous>, transform_indices = @transform_10, window_bounds = array<i64: 1, 128>}]} {
    %c0 = arith.constant 0 : index
    %c0_0 = arith.constant 0 : index
    %0 = vector.load %arg1[%c0, %c0_0] : memref<64x32xf32, #tpu.memory_space<vmem>>, vector<64x32xf32>
    %c0_1 = arith.constant 0 : index
    %c0_2 = arith.constant 0 : index
    %1 = vector.load %arg3[%c0_1, %c0_2] : memref<32x32xf32, #tpu.memory_space<vmem>>, vector<32x32xf32>
    %cst = arith.constant dense<0.000000e+00> : vector<64x32xf32>
    %2 = tpu.matmul %0, %1, %cst {dimension_numbers = #tpu.dot_dimension_numbers<[1], [0], [0], [1], [0, 0, 1, 1], [], []>} : vector<64x32xf32>, vector<32x32xf32>, vector<64x32xf32> -> vector<64x32xf32>
    %c0_3 = arith.constant 0 : index
    %c0_4 = arith.constant 0 : index
    %3 = vector.load %arg5[%c0_3, %c0_4] : memref<1x32xf32, #tpu.memory_space<vmem>>, vector<1x32xf32>
    %4 = vector.broadcast %3 : vector<1x32xf32> to vector<64x32xf32>
    %5 = arith.addf %2, %4 : vector<64x32xf32>
    %c0_5 = arith.constant 0 : index
    %c0_6 = arith.constant 0 : index
    %6 = vector.load %arg4[%c0_5, %c0_6] : memref<32x32xf32, #tpu.memory_space<vmem>>, vector<32x32xf32>
    %c0_7 = arith.constant 0 : index
    %c0_8 = arith.constant 0 : index
    %7 = vector.load %arg2[%c0_7, %c0_8] : memref<8x32xf32, #tpu.memory_space<vmem>>, vector<8x32xf32>
    %8 = vector.extract_strided_slice %5 {offsets = [0, 0], sizes = [8, 32], strides = [1, 1]} : vector<64x32xf32> to vector<8x32xf32>
    %cst_9 = arith.constant dense<0.000000e+00> : vector<8x32xf32>
    %9 = tpu.matmul %7, %6, %cst_9 {dimension_numbers = #tpu.dot_dimension_numbers<[1], [0], [0], [1], [0, 0, 1, 1], [], []>} : vector<8x32xf32>, vector<32x32xf32>, vector<8x32xf32> -> vector<8x32xf32>
    %10 = arith.addf %8, %9 : vector<8x32xf32>
    %11 = math.tanh %10 : vector<8x32xf32>
    %12 = vector.extract_strided_slice %5 {offsets = [8, 0], sizes = [8, 32], strides = [1, 1]} : vector<64x32xf32> to vector<8x32xf32>
    %cst_10 = arith.constant dense<0.000000e+00> : vector<8x32xf32>
    %13 = tpu.matmul %11, %6, %cst_10 {dimension_numbers = #tpu.dot_dimension_numbers<[1], [0], [0], [1], [0, 0, 1, 1], [], []>} : vector<8x32xf32>, vector<32x32xf32>, vector<8x32xf32> -> vector<8x32xf32>
    %14 = arith.addf %12, %13 : vector<8x32xf32>
    %15 = math.tanh %14 : vector<8x32xf32>
    %16 = vector.extract_strided_slice %5 {offsets = [16, 0], sizes = [8, 32], strides = [1, 1]} : vector<64x32xf32> to vector<8x32xf32>
    %cst_11 = arith.constant dense<0.000000e+00> : vector<8x32xf32>
    %17 = tpu.matmul %15, %6, %cst_11 {dimension_numbers = #tpu.dot_dimension_numbers<[1], [0], [0], [1], [0, 0, 1, 1], [], []>} : vector<8x32xf32>, vector<32x32xf32>, vector<8x32xf32> -> vector<8x32xf32>
    %18 = arith.addf %16, %17 : vector<8x32xf32>
    %19 = math.tanh %18 : vector<8x32xf32>
    %20 = vector.extract_strided_slice %5 {offsets = [24, 0], sizes = [8, 32], strides = [1, 1]} : vector<64x32xf32> to vector<8x32xf32>
    %cst_12 = arith.constant dense<0.000000e+00> : vector<8x32xf32>
    %21 = tpu.matmul %19, %6, %cst_12 {dimension_numbers = #tpu.dot_dimension_numbers<[1], [0], [0], [1], [0, 0, 1, 1], [], []>} : vector<8x32xf32>, vector<32x32xf32>, vector<8x32xf32> -> vector<8x32xf32>
    %22 = arith.addf %20, %21 : vector<8x32xf32>
    %23 = math.tanh %22 : vector<8x32xf32>
    %24 = vector.extract_strided_slice %5 {offsets = [32, 0], sizes = [8, 32], strides = [1, 1]} : vector<64x32xf32> to vector<8x32xf32>
    %cst_13 = arith.constant dense<0.000000e+00> : vector<8x32xf32>
    %25 = tpu.matmul %23, %6, %cst_13 {dimension_numbers = #tpu.dot_dimension_numbers<[1], [0], [0], [1], [0, 0, 1, 1], [], []>} : vector<8x32xf32>, vector<32x32xf32>, vector<8x32xf32> -> vector<8x32xf32>
    %26 = arith.addf %24, %25 : vector<8x32xf32>
    %27 = math.tanh %26 : vector<8x32xf32>
    %28 = vector.extract_strided_slice %5 {offsets = [40, 0], sizes = [8, 32], strides = [1, 1]} : vector<64x32xf32> to vector<8x32xf32>
    %cst_14 = arith.constant dense<0.000000e+00> : vector<8x32xf32>
    %29 = tpu.matmul %27, %6, %cst_14 {dimension_numbers = #tpu.dot_dimension_numbers<[1], [0], [0], [1], [0, 0, 1, 1], [], []>} : vector<8x32xf32>, vector<32x32xf32>, vector<8x32xf32> -> vector<8x32xf32>
    %30 = arith.addf %28, %29 : vector<8x32xf32>
    %31 = math.tanh %30 : vector<8x32xf32>
    %32 = vector.extract_strided_slice %5 {offsets = [48, 0], sizes = [8, 32], strides = [1, 1]} : vector<64x32xf32> to vector<8x32xf32>
    %cst_15 = arith.constant dense<0.000000e+00> : vector<8x32xf32>
    %33 = tpu.matmul %31, %6, %cst_15 {dimension_numbers = #tpu.dot_dimension_numbers<[1], [0], [0], [1], [0, 0, 1, 1], [], []>} : vector<8x32xf32>, vector<32x32xf32>, vector<8x32xf32> -> vector<8x32xf32>
    %34 = arith.addf %32, %33 : vector<8x32xf32>
    %35 = math.tanh %34 : vector<8x32xf32>
    %36 = vector.extract_strided_slice %5 {offsets = [56, 0], sizes = [8, 32], strides = [1, 1]} : vector<64x32xf32> to vector<8x32xf32>
    %cst_16 = arith.constant dense<0.000000e+00> : vector<8x32xf32>
    %37 = tpu.matmul %35, %6, %cst_16 {dimension_numbers = #tpu.dot_dimension_numbers<[1], [0], [0], [1], [0, 0, 1, 1], [], []>} : vector<8x32xf32>, vector<32x32xf32>, vector<8x32xf32> -> vector<8x32xf32>
    %38 = arith.addf %36, %37 : vector<8x32xf32>
    %39 = math.tanh %38 : vector<8x32xf32>
    %40 = tpu.concatenate %11, %15, %19, %23, %27, %31, %35, %39 in 0 : vector<8x32xf32>, vector<8x32xf32>, vector<8x32xf32>, vector<8x32xf32>, vector<8x32xf32>, vector<8x32xf32>, vector<8x32xf32>, vector<8x32xf32> -> vector<64x32xf32>
    %c0_17 = arith.constant 0 : index
    %c0_18 = arith.constant 0 : index
    %41 = vector.load %arg6[%c0_17, %c0_18] : memref<32x128xf32, #tpu.memory_space<vmem>>, vector<32x128xf32>
    %cst_19 = arith.constant dense<0.000000e+00> : vector<64x128xf32>
    %42 = tpu.matmul %40, %41, %cst_19 {dimension_numbers = #tpu.dot_dimension_numbers<[1], [0], [0], [1], [0, 0, 1, 1], [], []>} : vector<64x32xf32>, vector<32x128xf32>, vector<64x128xf32> -> vector<64x128xf32>
    %c0_20 = arith.constant 0 : index
    %c0_21 = arith.constant 0 : index
    %43 = vector.load %arg7[%c0_20, %c0_21] : memref<1x128xf32, #tpu.memory_space<vmem>>, vector<1x128xf32>
    %44 = vector.broadcast %43 : vector<1x128xf32> to vector<64x128xf32>
    %45 = arith.addf %42, %44 : vector<64x128xf32>
    %c0_22 = arith.constant 0 : index
    %c0_23 = arith.constant 0 : index
    %46 = vector.load %arg8[%c0_22, %c0_23] : memref<64x128xf32, #tpu.memory_space<vmem>>, vector<64x128xf32>
    %cst_24 = arith.constant 0.000000e+00 : f32
    %47 = vector.broadcast %cst_24 : f32 to vector<64x128xf32>
    %48 = arith.cmpf ogt, %46, %47 : vector<64x128xf32>
    %cst_25 = arith.constant -1.000000e+30 : f32
    %49 = vector.broadcast %cst_25 : f32 to vector<64x128xf32>
    %50 = arith.select %48, %45, %49 : vector<64x128xi1>, vector<64x128xf32>
    %cst_26 = arith.constant dense<0xFF800000> : vector<64xf32>
    %51 = vector.multi_reduction <maximumf>, %50, %cst_26 [1] : vector<64x128xf32> to vector<64xf32>
    %52 = vector.shape_cast %51 : vector<64xf32> to vector<64x1xf32>
    %53 = vector.broadcast %52 : vector<64x1xf32> to vector<64x128xf32>
    %54 = arith.subf %50, %53 : vector<64x128xf32>
    %55 = math.exp %54 : vector<64x128xf32>
    %cst_27 = arith.constant dense<0.000000e+00> : vector<64xf32>
    %56 = vector.multi_reduction <add>, %55, %cst_27 [1] : vector<64x128xf32> to vector<64xf32>
    %57 = vector.shape_cast %56 : vector<64xf32> to vector<64x1xf32>
    %58 = math.log %57 : vector<64x1xf32>
    %59 = arith.addf %52, %58 : vector<64x1xf32>
    %60 = tpu.iota {dimensions = array<i32: 1>} : vector<64x128xi32>
    %c0_28 = arith.constant 0 : index
    %c0_29 = arith.constant 0 : index
    %61 = vector.load %arg9[%c0_28, %c0_29] : memref<64x1xi32, #tpu.memory_space<vmem>>, vector<64x1xi32>
    %62 = vector.broadcast %61 : vector<64x1xi32> to vector<64x128xi32>
    %63 = arith.cmpi eq, %60, %62 : vector<64x128xi32>
    %64 = arith.extui %63 : vector<64x128xi1> to vector<64x128xi32>
    %65 = arith.sitofp %64 : vector<64x128xi32> to vector<64x128xf32>
    %66 = arith.mulf %50, %65 : vector<64x128xf32>
    %cst_30 = arith.constant dense<0.000000e+00> : vector<64xf32>
    %67 = vector.multi_reduction <add>, %66, %cst_30 [1] : vector<64x128xf32> to vector<64xf32>
    %68 = vector.shape_cast %67 : vector<64xf32> to vector<64x1xf32>
    %69 = arith.subf %68, %59 : vector<64x1xf32>
    %c0_31 = arith.constant 0 : index
    %c0_32 = arith.constant 0 : index
    %70 = vector.load %arg10[%c0_31, %c0_32] : memref<64x1xf32, #tpu.memory_space<vmem>>, vector<64x1xf32>
    %71 = arith.mulf %69, %70 : vector<64x1xf32>
    %72 = tpu.iota {dimensions = array<i32: 0>} : vector<64x128xi32>
    %73 = tpu.iota {dimensions = array<i32: 1>} : vector<64x128xi32>
    %c8_i32 = arith.constant 8 : i32
    %c0_i32 = arith.constant 0 : i32
    %74 = arith.cmpi eq, %c8_i32, %c0_i32 : i32
    %c1_i32 = arith.constant 1 : i32
    %75 = arith.select %74, %c1_i32, %c8_i32 : i32
    %76 = vector.broadcast %75 : i32 to vector<64x128xi32>
    %77 = arith.remsi %72, %76 : vector<64x128xi32>
    %c0_i32_33 = arith.constant 0 : i32
    %78 = vector.broadcast %c0_i32_33 : i32 to vector<64x128xi32>
    %79 = arith.cmpi ne, %77, %78 : vector<64x128xi32>
    %c0_i32_34 = arith.constant 0 : i32
    %80 = vector.broadcast %c0_i32_34 : i32 to vector<64x128xi32>
    %81 = arith.cmpi slt, %77, %80 : vector<64x128xi32>
    %c0_i32_35 = arith.constant 0 : i32
    %82 = arith.cmpi slt, %75, %c0_i32_35 : i32
    %83 = vector.broadcast %82 : i1 to vector<64x128xi1>
    %84 = vector.broadcast %83 : vector<64x128xi1> to vector<64x128xi1>
    %85 = arith.xori %81, %84 : vector<64x128xi1>
    %86 = arith.andi %85, %79 : vector<64x128xi1>
    %87 = vector.broadcast %75 : i32 to vector<64x128xi32>
    %88 = arith.addi %77, %87 : vector<64x128xi32>
    %89 = arith.select %86, %88, %77 : vector<64x128xi1>, vector<64x128xi32>
    %90 = arith.cmpi eq, %89, %73 : vector<64x128xi32>
    %91 = arith.extui %90 : vector<64x128xi1> to vector<64x128xi32>
    %92 = arith.sitofp %91 : vector<64x128xi32> to vector<64x128xf32>
    %93 = vector.broadcast %71 : vector<64x1xf32> to vector<64x128xf32>
    %94 = arith.mulf %93, %92 : vector<64x128xf32>
    %cst_36 = arith.constant dense<0.000000e+00> : vector<128xf32>
    %95 = vector.multi_reduction <add>, %94, %cst_36 [0] : vector<64x128xf32> to vector<128xf32>
    %96 = vector.shape_cast %95 : vector<128xf32> to vector<1x128xf32>
    %c0_37 = arith.constant 0 : index
    %c0_38 = arith.constant 0 : index
    %97 = vector.load %arg11[%c0_37, %c0_38] : memref<1x128xf32, #tpu.memory_space<vmem>>, vector<1x128xf32>
    tpu.vector_store %arg11[%c0_37, %c0_38], %96 {strides = array<i32>} : memref<1x128xf32, #tpu.memory_space<vmem>>, vector<1x128xf32>,
    return
  }
  func.func @transform_0(%arg0: i32) -> (i32, i32) {
    %c0_i32 = arith.constant 0 : i32
    %c0_i32_0 = arith.constant 0 : i32
    %c0_i32_1 = arith.constant 0 : i32
    return %c0_i32, %c0_i32_0 : i32, i32
  }
  func.func @transform_1(%arg0: i32) -> (i32, i32) {
    %c0_i32 = arith.constant 0 : i32
    %c0_i32_0 = arith.constant 0 : i32
    %c0_i32_1 = arith.constant 0 : i32
    return %c0_i32, %c0_i32_0 : i32, i32
  }
  func.func @transform_2(%arg0: i32) -> (i32, i32) {
    %c0_i32 = arith.constant 0 : i32
    %c0_i32_0 = arith.constant 0 : i32
    %c0_i32_1 = arith.constant 0 : i32
    return %c0_i32, %c0_i32_0 : i32, i32
  }
  func.func @transform_3(%arg0: i32) -> (i32, i32) {
    %c0_i32 = arith.constant 0 : i32
    %c0_i32_0 = arith.constant 0 : i32
    %c0_i32_1 = arith.constant 0 : i32
    return %c0_i32, %c0_i32_0 : i32, i32
  }
  func.func @transform_4(%arg0: i32) -> (i32, i32) {
    %c0_i32 = arith.constant 0 : i32
    %c0_i32_0 = arith.constant 0 : i32
    %c0_i32_1 = arith.constant 0 : i32
    return %c0_i32, %c0_i32_0 : i32, i32
  }
  func.func @transform_5(%arg0: i32) -> (i32, i32) {
    %c0_i32 = arith.constant 0 : i32
    %c0_i32_0 = arith.constant 0 : i32
    %c0_i32_1 = arith.constant 0 : i32
    return %c0_i32, %c0_i32_0 : i32, i32
  }
  func.func @transform_6(%arg0: i32) -> (i32, i32) {
    %c0_i32 = arith.constant 0 : i32
    %c0_i32_0 = arith.constant 0 : i32
    %c0_i32_1 = arith.constant 0 : i32
    return %c0_i32, %c0_i32_0 : i32, i32
  }
  func.func @transform_7(%arg0: i32) -> (i32, i32) {
    %c0_i32 = arith.constant 0 : i32
    %c0_i32_0 = arith.constant 0 : i32
    %c0_i32_1 = arith.constant 0 : i32
    return %c0_i32, %c0_i32_0 : i32, i32
  }
  func.func @transform_8(%arg0: i32) -> (i32, i32) {
    %c0_i32 = arith.constant 0 : i32
    %c0_i32_0 = arith.constant 0 : i32
    %c0_i32_1 = arith.constant 0 : i32
    return %c0_i32, %c0_i32_0 : i32, i32
  }
  func.func @transform_9(%arg0: i32) -> (i32, i32) {
    %c0_i32 = arith.constant 0 : i32
    %c0_i32_0 = arith.constant 0 : i32
    %c0_i32_1 = arith.constant 0 : i32
    return %c0_i32, %c0_i32_0 : i32, i32
  }
  func.func @transform_10(%arg0: i32) -> (i32, i32) {
    %c0_i32 = arith.constant 0 : i32
    %c0_i32_0 = arith.constant 0 : i32
    %c0_i32_1 = arith.constant 0 : i32
    return %c0_i32, %c0_i32_0 : i32, i32
  }
}

</mosaic_0001>

<bundles_post_ra>
// kernel: tpu_custom_call.1
= control target key start
LH: loop header
LB: loop body
LE: loop exit
PB: predicated region body
PF: predicated region fallthrough
CT: control target
= control target key end

     0   :  { %vm55_vm0 = vcmask 261120   ;;  %s2125_s0 = inlined_call_operand.vmem [shape: f32[64,32], index: 0, kind: input, shape index: {}]   ;;  %s2126_s1 = inlined_call_operand.vmem [shape: f32[8,32], index: 1, kind: input, shape index: {}]   ;;  %s2127_s2 = inlined_call_operand.vmem [shape: f32[32,32], index: 2, kind: input, shape index: {}]   ;;  %s2128_s3 = inlined_call_operand.vmem [shape: f32[32,32], index: 3, kind: input, shape index: {}]   ;;  %s2129_s4 = inlined_call_operand.vmem [shape: f32[1,32], index: 4, kind: input, shape index: {}]   ;;  %s2130_s5 = inlined_call_operand.vmem [shape: f32[32,128], index: 5, kind: input, shape index: {}]   ;;  %s2131_s6 = inlined_call_operand.vmem [shape: f32[1,128], index: 6, kind: input, shape index: {}]   ;;  %s2132_s7 = inlined_call_operand.vmem [shape: f32[64,128], index: 7, kind: input, shape index: {}]   ;;  %s2133_s8 = inlined_call_operand.vmem [shape: s32[64,1], index: 8, kind: input, shape index: {}]   ;;  %s2134_s9 = inlined_call_operand.vmem [shape: f32[64,1], index: 9, kind: input, shape index: {}]   ;;  %s2135_s10 = inlined_call_operand.hbm [shape: f32[1,128], index: 10, kind: output, shape index: {}]  }
   0x1   :  { %v44_v0 = vld [vmem:[%s2127_s2] sm:$0xff]  ;;  %v45_v1 = vld [vmem:[%s2127_s2 + $0x8] sm:$0xff]  ;;  %v46_v2 = vld [vmem:[%s2127_s2 + $0x10] sm:$0xff] }
   0x2   :  { %v1558_v3 = vpack.c.bf16 %v45_v1, %v44_v0  ;;  %v47_v4 = vld [vmem:[%s2127_s2 + $0x18] sm:$0xff]  ;;  %v40_v5 = vld [vmem:[%s2125_s0 + $0x20] sm:$0xff]  ;;  %v186_v9 = vld [vmem:[%s2128_s3 + $0x8] sm:$0xff] }
   0x3   :  { %v1562_v6 = vpack.c.bf16 %v47_v4, %v46_v2  ;;  %1444 = vmatprep.mubr.msk.f32.mxu1 %vm55_vm0, %v40_v5  ;;  %v36_v7 = vld [vmem:[%s2125_s0] sm:$0xff] }
   0x4   :  { %1622 = vmatprep.subr.bf16.mxu1 %v1558_v3  ;;  %1559 = vmatprep.subr.bf16.mxu0 %v1558_v3  ;;  %v185_v8 = vld [vmem:[%s2128_s3] sm:$0xff] }
   0x5   :  { %1624 = vmatpush3.bf16.msra.mxu1 %v1558_v3  ;;  %1561 = vmatpush3.bf16.msra.mxu0 %v1558_v3 }
   0x6   :  { %1623 = vmatprep.subr.bf16.mxu1 %v1562_v6  ;;  %1563 = vmatprep.subr.bf16.mxu0 %v1562_v6 }
   0x7   :  { %15 = vsyncpa [#allocation3], 0  ;;  %1438 = vmatprep.mubr.msk.f32.mxu0 %vm55_vm0, %v36_v7  ;;  %v41_v10 = vld [vmem:[%s2125_s0 + $0x28] sm:$0xff]  ;;  %v1794_v11 = vpack.c.bf16 %v186_v9, %v185_v8  ;;  %v1705_v13 = vmov 0.0|0.0   ;;  %v42_v14 = vld [vmem:[%s2125_s0 + $0x30] sm:$0xff]  ;;  %vm1706_vm1 = vmmov 0  }
   0x8   :  { %v37_v12 = vld [vmem:[%s2125_s0 + $0x8] sm:$0xff]  ;;  %v187_v15 = vld [vmem:[%s2128_s3 + $0x10] sm:$0xff]  ;;  %v188_v16 = vld [vmem:[%s2128_s3 + $0x18] sm:$0xff]  ;;  %v1707_v19 = vmov 0.0  }
   0x9   :  { %1625 = vmatpush3.bf16.msra.mxu1 %v1562_v6  ;;  %1565 = vmatpush3.bf16.msra.mxu0 %v1562_v6  ;;  %v43_v17 = vld [vmem:[%s2125_s0 + $0x38] sm:$0xff]  ;;  %v1817_v18 = vpack.c.bf16 %v188_v16, %v187_v15  ;;  %v189_v20 = vld [vmem:[%s2126_s1] sm:$0xff]  ;;  %v38_v33 = vld [vmem:[%s2125_s0 + $0x10] sm:$0xff] }
   0xa   :  { %1566 = vmatprep.subr.bf16.mxu1 %v1705_v13  ;;  %1578 = vmatprep.subr.bf16.mxu0 %v1705_v13  ;;  %v1844_v25 = vld [vmem:[%s2129_s4] ss:$0 sm:$0xff]  ;;  %v39_v34 = vld [vmem:[%s2125_s0 + $0x18] sm:$0xff]  ;;  %v791_v58 = vld [vmem:[%s2130_s5 + $0x8] sm:$0xff] }
   0xb   :  { %v790_v57 = vld [vmem:[%s2130_s5] sm:$0xff]  ;;  %v792_v0 = vld [vmem:[%s2130_s5 + $0x10] sm:$0xff]  ;;  %v793_v1 = vld [vmem:[%s2130_s5 + $0x18] sm:$0xff] }
   0xc   :  { %1445 = vmatmul.mubr.msk.f32.vlgmr.msra.gmra.mrb[0].mxu1 %vm55_vm0, %v41_v10  ;;  %1439 = vmatmul.mubr.msk.f32.vlgmr.msra.gmra.mrb[0].mxu0 %vm55_vm0, %v37_v12  ;;  %v1614_v59 = vpack.c.bf16 %v791_v58, %v790_v57  ;;  %v1618_v2 = vpack.c.bf16 %v793_v1, %v792_v0  ;;  %v910_v8 = vld [vmem:[%s2132_s7 + $0x8] sm:$0xff]  ;;  %v1341_v9 = vld [vmem:[%s2131_s6] ss:$0 sm:$0xff]  ;;  %v1021_v58 = vld [vmem:[%s2133_s8 + $0x30] sm:$0xff] }
   0xd   :  { %1568 = vmatpush3.bf16.msra.mxu1 %v1794_v11  ;;  %1447 = vmatprep.mubr.msk.f32.mxu1 %vm55_vm0, %v42_v14  ;;  %vm918_vm2 = vcmp.gt.f32.partialorder %v910_v8, 0.0  ;;  %v909_v14 = vld [vmem:[%s2132_s7] sm:$0xff] }
   0xe   :  { %1569 = vmatprep.subr.bf16.mxu1 %v1705_v13  ;;  %1580 = vmatpush3.bf16.msra.mxu0 %v1794_v11  ;;  %vm917_vm4 = vcmp.gt.f32.partialorder %v909_v14, 0.0 }
   0xf   :  { %1581 = vmatprep.subr.bf16.mxu0 %v1705_v13  ;;  %1441 = vmatprep.mubr.msk.f32.mxu0 %vm55_vm0, %v38_v33 }
  0x10   :  { %1448 = vmatmul.mubr.msk.f32.gmra.mrb[2].mxu1 %vm55_vm0, %v43_v17  ;;  %1442 = vmatmul.mubr.msk.f32.gmra.mrb[2].mxu0 %vm55_vm0, %v39_v34 }
  0x11   :  { %1571 = vmatpush3.bf16.msra.mxu1 %v1817_v18  ;;  %1458 = vmatprep.mubr.msk.f32.mxu1 %vm1706_vm1, %v1707_v19 }
  0x12   :  { %1572 = vmatprep.subr.bf16.mxu1 %v1705_v13  ;;  %1583 = vmatpush3.bf16.msra.mxu0 %v1817_v18 }
  0x13   :  { %1590 = vmatprep.subr.bf16.mxu0 %v1705_v13  ;;  %1480 = vmatprep.mubr.msk.f32.mxu0 %vm1706_vm1, %v1707_v19 }
  0x14   :  { %1459 = vmatmul.mubr.msk.f32.vlgmr.msra.gmra.mrb[4].mxu1 %vm55_vm0, %v189_v20 }
  0x15   :  { %1574 = vmatpush3.bf16.msra.mxu1 %v1794_v11  ;;  %1469 = vmatprep.mubr.msk.f32.mxu1 %vm1706_vm1, %v1707_v19 }
  0x16   :  { %1575 = vmatprep.subr.bf16.mxu1 %v1705_v13 }
  0x19   :  { %1577 = vmatpush3.bf16.msra.mxu1 %v1817_v18 }
  0x1a   :  { %1584 = vmatprep.subr.bf16.mxu1 %v1705_v13 }
  0xdf   :  { %v1839_v21 = vpop.f32.mrb[0].mxu1  ;;  %v1440_v22 = vpop.f32.mrb[0].mxu0 }
  0xe0   :  { %v166_v23 = vpop.f32.mrb[1].mxu1  ;;  %v146_v24 = vpop.f32.mrb[1].mxu0  ;;  %v152_v35 = vadd.f32 %v1440_v22, %v1844_v25  ;;  %v172_v60 = vadd.f32 %v1839_v21, %v1844_v25  ;;  %v911_v22 = vld [vmem:[%s2132_s7 + $0x10] sm:$0xff] }
  0xe1   :  { %v147_v28 = vadd.f32 %v1844_v25, %v146_v24  ;;  %v167_v52 = vadd.f32 %v1844_v25, %v166_v23  ;;  %v913_v23 = vld [vmem:[%s2132_s7 + $0x20] sm:$0xff]  ;;  %vm919_vm5 = vcmp.gt.f32.partialorder %v911_v22, 0.0 }
  0xe2   :  { %vm921_vm6 = vcmp.gt.f32.partialorder %v913_v23, 0.0 }
  0xe3   :  { %v1846_v26 = vpop.f32.mrb[2].mxu1  ;;  %v1443_v40 = vpop.f32.mrb[2].mxu0 }
  0xe4   :  { %v1848_v27 = vpop.f32.mrb[3].mxu1  ;;  %v156_v41 = vpop.f32.mrb[3].mxu0  ;;  %v162_v47 = vadd.f32 %v1443_v40, %v1844_v25 }
  0xe5   :  { %v157_v42 = vadd.f32 %v1844_v25, %v156_v41  ;;  %v177_v4 = vadd.f32 %v1844_v25, %v1848_v27 }
  0xe7   :  { %v259_v29 = vpop.f32.mrb[4].mxu1 }
  0xe8   :  { %v263_v30 = vadd.f32 %v259_v29, %v147_v28  ;;  %v1460_v31 = vpop.f32.mrb[5].mxu1 }
  0xe9   :  { %v914_v31 = vld [vmem:[%s2132_s7 + $0x28] sm:$0xff] }
  0xea   :  { %1633 = vtanh.f32 %v263_v30  ;;  %vm922_vm7 = vcmp.gt.f32.partialorder %v914_v31, 0.0 }
  0xf4   :  { %v1851_v32 = vpop.eup %1633 }
  0xf5   :  { %1470 = vmatmul.mubr.msk.f32.vlgmr.msra.gmra.mrb[6].mxu1 %vm55_vm0, %v1851_v32 }
  0xf6   :  { %1586 = vmatpush3.bf16.msra.mxu1 %v1794_v11  ;;  %1491 = vmatprep.mubr.msk.f32.mxu1 %vm1706_vm1, %v1707_v19 }
  0xf7   :  { %1587 = vmatprep.subr.bf16.mxu1 %v1705_v13 }
  0xfa   :  { %1589 = vmatpush3.bf16.msra.mxu1 %v1817_v18 }
  0xfb   :  { %1596 = vmatprep.subr.bf16.mxu1 %v1705_v13 }
 0x1c8   :  { %v334_v36 = vpop.f32.mrb[6].mxu1 }
 0x1c9   :  { %v338_v37 = vadd.f32 %v334_v36, %v152_v35  ;;  %v1471_v38 = vpop.f32.mrb[7].mxu1 }
 0x1cb   :  { %1635 = vtanh.f32 %v338_v37  ;;  %v182_v37 = vadd.f32 %v1846_v26, %v1844_v25 }
 0x1d5   :  { %v1636_v39 = vpop.eup %1635 }
 0x1d6   :  { %1481 = vmatmul.mubr.msk.f32.vlgmr.msra.gmra.mrb[4].mxu0 %vm55_vm0, %v1636_v39 }
 0x1d7   :  { %1592 = vmatpush3.bf16.msra.mxu0 %v1794_v11  ;;  %1502 = vmatprep.mubr.msk.f32.mxu0 %vm1706_vm1, %v1707_v19 }
 0x1d8   :  { %1593 = vmatprep.subr.bf16.mxu0 %v1705_v13 }
 0x1db   :  { %1595 = vmatpush3.bf16.msra.mxu0 %v1817_v18 }
 0x1dc   :  { %1602 = vmatprep.subr.bf16.mxu0 %v1705_v13 }
 0x2a9   :  { %v409_v43 = vpop.f32.mrb[4].mxu0 }
 0x2aa   :  { %v413_v44 = vadd.f32 %v409_v43, %v157_v42  ;;  %v1482_v45 = vpop.f32.mrb[5].mxu0  ;;  %v1708_v42 = vmov 0   ;;  %v916_v43 = vld [vmem:[%s2132_s7 + $0x38] sm:$0xff] }
 0x2ab   :  { %1632 = vset.pattern.permute.xlu1 %v1708_v42  ;;  %1631 = vset.pattern.permute.xlu0 %v1708_v42  ;;  %vm924_vm8 = vcmp.gt.f32.partialorder %v916_v43, 0.0 }
 0x2ac   :  { %1637 = vtanh.f32 %v413_v44  ;;  %v915_v44 = vld [vmem:[%s2132_s7 + $0x30] sm:$0xff] }
 0x2ad   :  { %vm923_vm9 = vcmp.gt.f32.partialorder %v915_v44, 0.0 }
 0x2b6   :  { %v1638_v46 = vpop.eup %1637 }
 0x2b7   :  { %1492 = vmatmul.mubr.msk.f32.vlgmr.msra.gmra.mrb[8].mxu1 %vm55_vm0, %v1638_v46 }
 0x2b8   :  { %1598 = vmatpush3.bf16.msra.mxu1 %v1794_v11  ;;  %1513 = vmatprep.mubr.msk.f32.mxu1 %vm1706_vm1, %v1707_v19 }
 0x2b9   :  { %1599 = vmatprep.subr.bf16.mxu1 %v1705_v13 }
 0x2bc   :  { %1601 = vmatpush3.bf16.msra.mxu1 %v1817_v18 }
 0x2bd   :  { %1608 = vmatprep.subr.bf16.mxu1 %v1705_v13 }
 0x38a   :  { %v484_v48 = vpop.f32.mrb[8].mxu1 }
 0x38b   :  { %v488_v49 = vadd.f32 %v484_v48, %v162_v47  ;;  %v1493_v50 = vpop.f32.mrb[9].mxu1 }
 0x38c   :  { %v1017_v50 = vld [vmem:[%s2133_s8 + $0x10] sm:$0xff] }
 0x38d   :  { %1639 = vtanh.f32 %v488_v49  ;;  %v1016_v49 = vld [vmem:[%s2133_s8 + $0x8] sm:$0xff] }
 0x397   :  { %v1640_v51 = vpop.eup %1639 }
 0x398   :  { %1503 = vmatmul.mubr.msk.f32.vlgmr.msra.gmra.mrb[6].mxu0 %vm55_vm0, %v1640_v51 }
 0x399   :  { %1604 = vmatpush3.bf16.msra.mxu0 %v1794_v11  ;;  %1524 = vmatprep.mubr.msk.f32.mxu0 %vm1706_vm1, %v1707_v19 }
 0x39a   :  { %1605 = vmatprep.subr.bf16.mxu0 %v1705_v13 }
 0x39d   :  { %1607 = vmatpush3.bf16.msra.mxu0 %v1817_v18 }
 0x39e   :  { %1615 = vmatprep.subr.bf16.mxu0 %v1614_v59 }
 0x46b   :  { %v559_v53 = vpop.f32.mrb[6].mxu0 }
 0x46c   :  { %v563_v54 = vadd.f32 %v559_v53, %v167_v52  ;;  %v1504_v55 = vpop.f32.mrb[7].mxu0  ;;  %v1018_v52 = vld [vmem:[%s2133_s8 + $0x18] sm:$0xff]  ;;  %v1019_v53 = vld [vmem:[%s2133_s8 + $0x20] sm:$0xff] }
 0x46e   :  { %1641 = vtanh.f32 %v563_v54 }
 0x478   :  { %v1642_v56 = vpop.eup %1641 }
 0x479   :  { %1514 = vmatmul.mubr.msk.f32.vlgmr.msra.gmra.mrb[10].mxu1 %vm55_vm0, %v1642_v56 }
 0x47a   :  { %1610 = vmatpush3.bf16.msra.mxu1 %v1794_v11  ;;  %1535 = vmatprep.mubr.msk.f32.mxu1 %vm1706_vm1, %v1707_v19 }
 0x47b   :  { %1611 = vmatprep.subr.bf16.mxu1 %v1705_v13  ;;  %v912_v13 = vld [vmem:[%s2132_s7 + $0x18] sm:$0xff] }
 0x47c   :  { %vm920_vm3 = vcmp.gt.f32.partialorder %v912_v13, 0.0 }
 0x47e   :  { %1613 = vmatpush3.bf16.msra.mxu1 %v1817_v18 }
 0x54c   :  { %v634_v61 = vpop.f32.mrb[10].mxu1 }
 0x54d   :  { %v638_v62 = vadd.f32 %v634_v61, %v172_v60  ;;  %v1515_v63 = vpop.f32.mrb[11].mxu1  ;;  %v1022_v61 = vld [vmem:[%s2133_s8 + $0x38] sm:$0xff] }
 0x54f   :  { %1643 = vtanh.f32 %v638_v62 }
 0x559   :  { %v1644_v3 = vpop.eup %1643 }
 0x55a   :  { %1525 = vmatmul.mubr.msk.f32.vlgmr.msra.gmra.mrb[8].mxu0 %vm55_vm0, %v1644_v3 }
 0x55b   :  { %1617 = vmatpush3.bf16.msra.mxu0 %v1614_v59  ;;  %1546 = vmatprep.mubr.msk.f32.mxu0 %vm55_vm0, %v1851_v32 }
 0x55c   :  { %1619 = vmatprep.subr.bf16.mxu0 %v1618_v2 }
 0x55f   :  { %1621 = vmatpush3.bf16.msra.mxu0 %v1618_v2 }
 0x562   :  { %1547 = vmatmul.mubr.msk.f32.vlgmr.msra.gmra.mrb[10].mxu0 %vm55_vm0, %v1636_v39 }
 0x563   :  { %1549 = vmatprep.mubr.msk.f32.mxu0 %vm55_vm0, %v1638_v46 }
 0x566   :  { %1550 = vmatmul.mubr.msk.f32.gmra.mrb[12].mxu0 %vm55_vm0, %v1640_v51  ;;  %v1015_v51 = vld [vmem:[%s2133_s8] sm:$0xff] }
 0x567   :  { %1552 = vmatprep.mubr.msk.f32.mxu0 %vm55_vm0, %v1642_v56  ;;  %v1020_v56 = vld [vmem:[%s2133_s8 + $0x28] sm:$0xff] }
 0x56a   :  { %1553 = vmatmul.mubr.msk.f32.gmra.mrb[14].mxu0 %vm55_vm0, %v1644_v3 }
 0x62d   :  { %v709_v5 = vpop.f32.mrb[8].mxu0 }
 0x62e   :  { %v713_v6 = vadd.f32 %v709_v5, %v177_v4  ;;  %v1526_v7 = vpop.f32.mrb[9].mxu0 }
 0x630   :  { %1645 = vtanh.f32 %v713_v6 }
 0x635   :  { %v1548_v10 = vpop.f32.mrb[10].mxu0 }
 0x636   :  { %v876_v11 = vadd.f32 %v1548_v10, %v1341_v9  ;;  %v870_v12 = vpop.f32.mrb[11].mxu0 }
 0x637   :  { %v871_v15 = vadd.f32 %v1341_v9, %v870_v12 }
 0x638   :  { %v1937_v16 = vsel %vm918_vm2, %v876_v11, -1e+30 }
 0x639   :  { %935 = vmax.xlane.f32.xlu0 %v1937_v16  ;;  %v1551_v17 = vpop.f32.mrb[12].mxu0  ;;  %v1950_v28 = vsel %vm917_vm4, %v871_v15, -1e+30 }
 0x63a   :  { %v1646_v18 = vpop.eup %1645  ;;  %v886_v20 = vadd.f32 %v1551_v17, %v1341_v9  ;;  %v880_v21 = vpop.f32.mrb[13].mxu0 }
 0x63b   :  { %1536 = vmatmul.mubr.msk.f32.vlgmr.msra.gmra.mrb[12].mxu1 %vm55_vm0, %v1646_v18  ;;  %1555 = vmatprep.mubr.msk.f32.mxu0 %vm55_vm0, %v1646_v18  ;;  %v881_v24 = vadd.f32 %v1341_v9, %v880_v21 }
 0x63c   :  { %v1948_v27 = vsel %vm920_vm3, %v886_v20, -1e+30 }
 0x63d   :  { %939 = vmax.xlane.f32.xlu1 %v1948_v27  ;;  %v1554_v29 = vpop.f32.mrb[14].mxu0  ;;  %933 = vmax.xlane.f32.xlu0 %v1950_v28  ;;  %v1957_v34 = vsel %vm919_vm5, %v881_v24, -1e+30 }
 0x63e   :  { %v890_v30 = vpop.f32.mrb[15].mxu0  ;;  %v896_v33 = vadd.f32 %v1554_v29, %v1341_v9  ;;  %v1013_v29 = vlaneseq }
 0x63f   :  { %v891_v32 = vadd.f32 %v1341_v9, %v890_v30 }
 0x640   :  { %v1963_v36 = vsel %vm922_vm7, %v896_v33, -1e+30  ;;  %v2038_v31 = vand.u32 127, %v1013_v29 }
 0x641   :  { %937 = vmax.xlane.f32.xlu1 %v1957_v34  ;;  %v1960_v35 = vsel %vm921_vm6, %v891_v32, -1e+30 }
 0x642   :  { %941 = vmax.xlane.f32.xlu0 %v1960_v35 }
 0x645   :  { %943 = vmax.xlane.f32.xlu1 %v1963_v36 }
 0x6c6   :  { %v1996_v54 = vpop.xlane.xlu0 %935 }
 0x6c7   :  { %v950_v59 = vsub.f32 %v1937_v16, %v1996_v54 }
 0x6c9   :  { %v959_v62 = vmul.f32 1.442695, %v950_v59 }
 0x6ca   :  { %v1998_v55 = vpop.xlane.xlu1 %939  ;;  %v2003_v57 = vpop.xlane.xlu0 %933 }
 0x6cb   :  { %v949_v6 = vsub.f32 %v1950_v28, %v2003_v57  ;;  %v952_v8 = vsub.f32 %v1948_v27, %v1998_v55 }
 0x6cd   :  { %v963_v11 = vmul.f32 1.442695, %v952_v8 }
 0x6ce   :  { %v2010_v60 = vpop.xlane.xlu1 %937 }
 0x6cf   :  { %v951_v63 = vsub.f32 %v1957_v34, %v2010_v60  ;;  %v2017_v0 = vpop.xlane.xlu0 %941 }
 0x6d0   :  { %v953_v2 = vsub.f32 %v1960_v35, %v2017_v0 }
 0x6d1   :  { %v961_v1 = vmul.f32 1.442695, %v951_v63 }
 0x6d2   :  { %v965_v3 = vmul.f32 1.442695, %v953_v2  ;;  %v2025_v10 = vpop.xlane.xlu1 %943 }
 0x6d3   :  { %v954_v12 = vsub.f32 %v1963_v36, %v2025_v10 }
 0x6d5   :  { %v967_v13 = vmul.f32 1.442695, %v954_v12  ;;  %v1104_v12 = vld [vmem:[%s2134_s9 + $0x8] sm:$0xff] }
 0x70e   :  { %v784_v38 = vpop.f32.mrb[12].mxu1 }
 0x70f   :  { %v788_v39 = vadd.f32 %v784_v38, %v182_v37  ;;  %v1537_v40 = vpop.f32.mrb[13].mxu1 }
 0x711   :  { %1647 = vtanh.f32 %v788_v39 }
 0x712   :  { %1649 = vpow2.f32 %v959_v62 }
 0x713   :  { %1651 = vpow2.f32 %v961_v1 }
 0x714   :  { %1653 = vpow2.f32 %v965_v3 }
 0x71b   :  { %v1648_v41 = vpop.eup %1647 }
 0x71c   :  { %1556 = vmatmul.mubr.msk.f32.gmra.mrb[16].mxu0 %vm55_vm0, %v1648_v41  ;;  %v1650_v4 = vpop.eup %1649 }
 0x71d   :  { %v1652_v5 = vpop.eup %1651 }
 0x71e   :  { %v1654_v7 = vpop.eup %1653 }
 0x7ef   :  { %v1557_v45 = vpop.f32.mrb[16].mxu0 }
 0x7f0   :  { %v906_v25 = vadd.f32 %v1557_v45, %v1341_v9  ;;  %v900_v26 = vpop.f32.mrb[17].mxu0 }
 0x7f1   :  { %v901_v46 = vadd.f32 %v1341_v9, %v900_v26  ;;  %v957_v9 = vmul.f32 1.442695, %v949_v6 }
 0x7f2   :  { %v1975_v47 = vsel %vm924_vm8, %v906_v25, -1e+30 }
 0x7f3   :  { %947 = vmax.xlane.f32.xlu1 %v1975_v47  ;;  %v1978_v48 = vsel %vm923_vm9, %v901_v46, -1e+30  ;;  %1655 = vpow2.f32 %v957_v9 }
 0x7f4   :  { %945 = vmax.xlane.f32.xlu0 %v1978_v48  ;;  %1657 = vpow2.f32 %v963_v11 }
 0x7f5   :  { %1659 = vpow2.f32 %v967_v13 }
 0x7fd   :  { %v1656_v14 = vpop.eup %1655 }
 0x7fe   :  { %v1658_v15 = vpop.eup %1657 }
 0x7ff   :  { %v1660_v17 = vpop.eup %1659 }
 0x804   :  { %1027 = vperm.xlu1 %1632, %v1016_v49  }
 0x808   :  { %1030 = vperm.xlu1 %1632, %v1017_v50  }
 0x80a   :  { %1024 = vperm.xlu0 %1631, %v1015_v51  }
 0x80c   :  { %1033 = vperm.xlu1 %1632, %v1018_v52  }
 0x810   :  { %1036 = vperm.xlu1 %1632, %v1019_v53  }
 0x814   :  { %1039 = vperm.xlu1 %1632, %v1020_v56  }
 0x818   :  { %1042 = vperm.xlu1 %1632, %v1021_v58  }
 0x81c   :  { %1045 = vperm.xlu1 %1632, %v1022_v61  }
 0x829   :  { %975 = vadd.xlane.f32.xlu0 %v1650_v4 }
 0x82d   :  { %977 = vadd.xlane.f32.xlu0 %v1652_v5 }
 0x831   :  { %981 = vadd.xlane.f32.xlu0 %v1654_v7 }
 0x840   :  { %973 = vadd.xlane.f32.xlu1 %v1656_v14 }
 0x844   :  { %979 = vadd.xlane.f32.xlu1 %v1658_v15 }
 0x848   :  { %983 = vadd.xlane.f32.xlu1 %v1660_v17 }
 0x880   :  { %v2029_v18 = vpop.xlane.xlu1 %947 }
 0x881   :  { %v956_v20 = vsub.f32 %v1975_v47, %v2029_v18  ;;  %v2033_v21 = vpop.xlane.xlu0 %945 }
 0x882   :  { %v955_v22 = vsub.f32 %v1978_v48, %v2033_v21 }
 0x883   :  { %v971_v23 = vmul.f32 1.442695, %v956_v20  ;;  %v1103_v20 = vld [vmem:[%s2134_s9] sm:$0xff] }
 0x884   :  { %v969_v24 = vmul.f32 1.442695, %v955_v22  ;;  %v1028_v30 = vpop.permute.xlu1 %1027 }
 0x885   :  { %1661 = vpow2.f32 %v971_v23  ;;  %vm1048_vm10 = vcmp.eq.s32.totalorder %v2038_v31, %v1028_v30 }
 0x886   :  { %1663 = vpow2.f32 %v969_v24  ;;  %v1351_v39 = vsel %vm1048_vm10, 1.0, %v1707_v19 }
 0x887   :  { %v1072_v43 = vmul.f32 %v1351_v39, %v1937_v16 }
 0x888   :  { %v1031_v32 = vpop.permute.xlu1 %1030 }
 0x889   :  { %v1025_v33 = vpop.permute.xlu0 %1024  ;;  %vm1049_vm13 = vcmp.eq.s32.totalorder %v2038_v31, %v1031_v32 }
 0x88a   :  { %vm1047_vm11 = vcmp.eq.s32.totalorder %v2038_v31, %v1025_v33  ;;  %v1352_v25 = vsel %vm1049_vm13, 1.0, %v1707_v19 }
 0x88b   :  { %v1350_v41 = vsel %vm1047_vm11, 1.0, %v1707_v19  ;;  %v1073_v50 = vmul.f32 %v1352_v25, %v1957_v34 }
 0x88c   :  { %v1034_v37 = vpop.permute.xlu1 %1033  ;;  %v1071_v45 = vmul.f32 %v1350_v41, %v1950_v28 }
 0x88d   :  { %vm1050_vm12 = vcmp.eq.s32.totalorder %v2038_v31, %v1034_v37  ;;  %v1106_v37 = vld [vmem:[%s2134_s9 + $0x18] sm:$0xff] }
 0x88e   :  { %v1353_v44 = vsel %vm1050_vm12, 1.0, %v1707_v19 }
 0x88f   :  { %v1662_v38 = vpop.eup %1661  ;;  %v1074_v46 = vmul.f32 %v1353_v44, %v1948_v27 }
 0x890   :  { %v1664_v40 = vpop.eup %1663  ;;  %987 = vadd.xlane.f32.xlu1 %v1662_v38  ;;  %v1037_v42 = vpop.permute.xlu1 %1036 }
 0x891   :  { %985 = vadd.xlane.f32.xlu0 %v1664_v40  ;;  %vm1051_vm14 = vcmp.eq.s32.totalorder %v2038_v31, %v1037_v42  ;;  %v1105_v40 = vld [vmem:[%s2134_s9 + $0x10] sm:$0xff] }
 0x892   :  { %v1354_v16 = vsel %vm1051_vm14, 1.0, %v1707_v19 }
 0x893   :  { %v1075_v52 = vmul.f32 %v1354_v16, %v1960_v35 }
 0x894   :  { %1081 = vadd.xlane.f32.xlu1 %v1072_v43  ;;  %v1040_v26 = vpop.permute.xlu1 %1039 }
 0x895   :  { %vm1052_vm15 = vcmp.eq.s32.totalorder %v2038_v31, %v1040_v26  ;;  %1079 = vadd.xlane.f32.xlu0 %v1071_v45 }
 0x896   :  { %v1355_v49 = vsel %vm1052_vm15, 1.0, %v1707_v19 }
 0x897   :  { %v1076_v28 = vmul.f32 %v1355_v49, %v1963_v36 }
 0x898   :  { %1085 = vadd.xlane.f32.xlu1 %v1074_v46  ;;  %v1043_v51 = vpop.permute.xlu1 %1042 }
 0x899   :  { %vm1053_vm0 = vcmp.eq.s32.totalorder %v2038_v31, %v1043_v51  ;;  %1083 = vadd.xlane.f32.xlu0 %v1073_v50  ;;  %v1107_v51 = vld [vmem:[%s2134_s9 + $0x20] sm:$0xff] }
 0x89a   :  { %v1356_v53 = vsel %vm1053_vm0, 1.0, %v1707_v19 }
 0x89b   :  { %v1077_v58 = vmul.f32 %v1356_v53, %v1978_v48 }
 0x89c   :  { %1089 = vadd.xlane.f32.xlu1 %v1076_v28  ;;  %v1046_v56 = vpop.permute.xlu1 %1045 }
 0x89d   :  { %vm1054_vm1 = vcmp.eq.s32.totalorder %v2038_v31, %v1046_v56  ;;  %1087 = vadd.xlane.f32.xlu0 %v1075_v52 }
 0x89e   :  { %v1357_v27 = vsel %vm1054_vm1, 1.0, %v1707_v19 }
 0x89f   :  { %v1078_v34 = vmul.f32 %v1357_v27, %v1975_v47 }
 0x8a1   :  { %1093 = vadd.xlane.f32.xlu1 %v1078_v34  ;;  %1091 = vadd.xlane.f32.xlu0 %v1077_v58  ;;  %v1109_v58 = vld [vmem:[%s2134_s9 + $0x30] sm:$0xff] }
 0x8b6   :  { %v976_v61 = vpop.xlane.xlu0 %975 }
 0x8b7   :  { %1665 = vlog2.f32 %v976_v61 }
 0x8ba   :  { %v978_v35 = vpop.xlane.xlu0 %977 }
 0x8be   :  { %v982_v63 = vpop.xlane.xlu0 %981 }
 0x8c1   :  { %v1666_v1 = vpop.eup %1665 }
 0x8c2   :  { %v992_v3 = vmul.f32 0.6931472, %v1666_v1 }
 0x8c4   :  { %v1006_v8 = vadd.f32 %v992_v3, %v1996_v54 }
 0x8cd   :  { %v974_v59 = vpop.xlane.xlu1 %973 }
 0x8ce   :  { %1667 = vlog2.f32 %v974_v59 }
 0x8d1   :  { %v980_v36 = vpop.xlane.xlu1 %979 }
 0x8d2   :  { %1669 = vlog2.f32 %v980_v36 }
 0x8d3   :  { %1671 = vlog2.f32 %v978_v35 }
 0x8d5   :  { %v984_v62 = vpop.xlane.xlu1 %983 }
 0x8d6   :  { %1673 = vlog2.f32 %v984_v62 }
 0x8d7   :  { %1675 = vlog2.f32 %v982_v63 }
 0x8d8   :  { %v1668_v2 = vpop.eup %1667 }
 0x8d9   :  { %v990_v4 = vmul.f32 0.6931472, %v1668_v2 }
 0x8db   :  { %v1005_v14 = vadd.f32 %v990_v4, %v2003_v57 }
 0x8dc   :  { %v1670_v47 = vpop.eup %1669 }
 0x8dd   :  { %v1672_v5 = vpop.eup %1671  ;;  %v996_v7 = vmul.f32 0.6931472, %v1670_v47 }
 0x8de   :  { %v994_v11 = vmul.f32 0.6931472, %v1672_v5 }
 0x8df   :  { %v1008_v54 = vadd.f32 %v996_v7, %v1998_v55 }
 0x8e0   :  { %v1674_v9 = vpop.eup %1673  ;;  %v1007_v57 = vadd.f32 %v994_v11, %v2010_v60  ;;  %v1108_v60 = vld [vmem:[%s2134_s9 + $0x28] sm:$0xff] }
 0x8e1   :  { %v1676_v15 = vpop.eup %1675  ;;  %v1000_v24 = vmul.f32 0.6931472, %v1674_v9 }
 0x8e2   :  { %v998_v32 = vmul.f32 0.6931472, %v1676_v15 }
 0x8e3   :  { %v1010_v44 = vadd.f32 %v1000_v24, %v2025_v10 }
 0x8e4   :  { %v1009_v49 = vadd.f32 %v998_v32, %v2017_v0  ;;  %v1110_v0 = vld [vmem:[%s2134_s9 + $0x38] sm:$0xff]  ;;  %s1709_s9 = smov [#allocation2]  }
 0x8e5   :  { %s1316_s25 = sshll.u32 %s1709_s9, 4  ;;  %s1317_s25 = int_to_ptr.vmem [resolvable:$true] %s1316_s25 }
 0x8e6   :  { %s1681_s26 = scalar_lea.vmem %s1317_s25, 16  ;;  %s1685_s2 = scalar_lea.vmem %s1317_s25, 32 }
 0x8e7   :  { %p1682_p0 = scmp.ne.s32.totalorder %s1317_s25, %s1681_s26  ;;  %p1686_p1 = scmp.lt.s32.totalorder %s1317_s25, %s1317_s25 }
 0x8e8   :  { %p1687_p2 = scmp.lt.s32.totalorder %s1685_s2, %s1681_s26 }
 0x8ea   :  { %p1688_p3 = por %p1687_p2, %p1686_p1 }
 0x8ec   :  { %p1689_p4 = pnand %p1688_p3, %p1682_p0 }
 0x91d   :  { %v988_v48 = vpop.xlane.xlu1 %987 }
 0x91e   :  { %1677 = vlog2.f32 %v988_v48  ;;  %v986_v6 = vpop.xlane.xlu0 %985 }
 0x91f   :  { %1679 = vlog2.f32 %v986_v6 }
 0x921   :  { %v1082_v13 = vpop.xlane.xlu1 %1081 }
 0x922   :  { %v1096_v17 = vsub.f32 %v1082_v13, %v1006_v8  ;;  %v1080_v22 = vpop.xlane.xlu0 %1079 }
 0x923   :  { %v1095_v23 = vsub.f32 %v1080_v22, %v1005_v14 }
 0x924   :  { %v1112_v30 = vmul.f32 %v1104_v12, %v1096_v17 }
 0x925   :  { %v1111_v33 = vmul.f32 %v1103_v20, %v1095_v23  ;;  %v1086_v38 = vpop.xlane.xlu1 %1085 }
 0x926   :  { %v1098_v39 = vsub.f32 %v1086_v38, %v1008_v54  ;;  %1255 = vperm.xlu1 %1632, %v1112_v30   ;;  %v1084_v41 = vpop.xlane.xlu0 %1083 }
 0x927   :  { %v1097_v42 = vsub.f32 %v1084_v41, %v1007_v57  ;;  %1250 = vperm.xlu0 %1631, %v1111_v33  }
 0x928   :  { %v1678_v43 = vpop.eup %1677  ;;  %v1114_v55 = vmul.f32 %v1106_v37, %v1098_v39 }
 0x929   :  { %v1680_v45 = vpop.eup %1679  ;;  %v1004_v25 = vmul.f32 0.6931472, %v1678_v43  ;;  %v1113_v26 = vmul.f32 %v1105_v40, %v1097_v42  ;;  %v1090_v46 = vpop.xlane.xlu1 %1089 }
 0x92a   :  { %v1002_v50 = vmul.f32 0.6931472, %v1680_v45  ;;  %v1100_v16 = vsub.f32 %v1090_v46, %v1010_v44  ;;  %v1088_v28 = vpop.xlane.xlu0 %1087 }
 0x92b   :  { %v1099_v52 = vsub.f32 %v1088_v28, %v1009_v49  ;;  %1260 = vperm.xlu1 %1632, %v1113_v26   ;;  %1265 = vperm.xlu0 %1631, %v1114_v55   ;;  %v1012_v27 = vadd.f32 %v1004_v25, %v2029_v18  ;;  %v1120_v18 = vshrl.u32 %v1013_v29, 7 }
 0x92c   :  { %v1116_v10 = vmul.f32 %v1108_v60, %v1100_v16  ;;  %v1011_v53 = vadd.f32 %v1002_v50, %v2033_v21 }
 0x92d   :  { %v1115_v56 = vmul.f32 %v1107_v51, %v1099_v52  ;;  %v1121_v21 = vadd.s32 8, %v1120_v18  ;;  %v1132_v1 = vand.u32 7, %v1120_v18  ;;  %v1122_v2 = vadd.s32 16, %v1120_v18 }
 0x92e   :  { %v1094_v34 = vpop.xlane.xlu1 %1093  ;;  %v1092_v59 = vpop.xlane.xlu0 %1091  ;;  %v1123_v3 = vadd.s32 24, %v1120_v18  ;;  %v1124_v4 = vadd.s32 32, %v1120_v18  ;;  %v1125_v5 = vadd.s32 40, %v1120_v18  ;;  %v1126_v9 = vadd.s32 48, %v1120_v18 }
 0x92f   :  { %v1102_v61 = vsub.f32 %v1094_v34, %v1012_v27  ;;  %v1101_v36 = vsub.f32 %v1092_v59, %v1011_v53  ;;  %1270 = vperm.xlu1 %1632, %v1115_v56   ;;  %1275 = vperm.xlu0 %1631, %v1116_v10   ;;  %v1139_v63 = vand.u32 7, %v1121_v21  ;;  %vm1224_vm3 = vcmp.eq.s32.totalorder %v1132_v1, %v2038_v31 }
 0x930   :  { %v1146_v47 = vand.u32 7, %v1122_v2  ;;  %v1153_v48 = vand.u32 7, %v1123_v3  ;;  %v1358_v7 = vsel %vm1224_vm3, 1.0, %v1707_v19  ;;  %v1160_v29 = vand.u32 7, %v1124_v4 }
 0x931   :  { %v1118_v35 = vmul.f32 %v1110_v0, %v1102_v61  ;;  %v1117_v62 = vmul.f32 %v1109_v58, %v1101_v36  ;;  %vm1225_vm2 = vcmp.eq.s32.totalorder %v1139_v63, %v2038_v31  ;;  %v1167_v14 = vand.u32 7, %v1125_v5 }
 0x932   :  { %v1359_v6 = vsel %vm1225_vm2, 1.0, %v1707_v19  ;;  %vm1226_vm4 = vcmp.eq.s32.totalorder %v1146_v47, %v2038_v31  ;;  %vm1227_vm5 = vcmp.eq.s32.totalorder %v1153_v48, %v2038_v31  ;;  %v1127_v15 = vadd.s32 56, %v1120_v18 }
 0x933   :  { %1285 = vperm.xlu0 %1631, %v1118_v35   ;;  %1280 = vperm.xlu1 %1632, %v1117_v62   ;;  %v1360_v17 = vsel %vm1226_vm4, 1.0, %v1707_v19  ;;  %vm1228_vm6 = vcmp.eq.s32.totalorder %v1160_v29, %v2038_v31  ;;  %v1174_v20 = vand.u32 7, %v1126_v9  ;;  %v1361_v23 = vsel %vm1227_vm5, 1.0, %v1707_v19 }
 0x934   :  { %vm1229_vm7 = vcmp.eq.s32.totalorder %v1167_v14, %v2038_v31  ;;  %v1181_v32 = vand.u32 7, %v1127_v15  ;;  %v1362_v33 = vsel %vm1228_vm6, 1.0, %v1707_v19 }
 0x935   :  { %vm1230_vm8 = vcmp.eq.s32.totalorder %v1174_v20, %v2038_v31  ;;  %v1363_v39 = vsel %vm1229_vm7, 1.0, %v1707_v19 }
 0x936   :  { %vm1231_vm9 = vcmp.eq.s32.totalorder %v1181_v32, %v2038_v31  ;;  %v1364_v43 = vsel %vm1230_vm8, 1.0, %v1707_v19 }
 0x937   :  { %v1365_v25 = vsel %vm1231_vm9, 1.0, %v1707_v19 }
 0x9a5   :  { %v1256_v8 = vpop.permute.xlu1 %1255 }
 0x9a6   :  { %v1251_v11 = vpop.permute.xlu0 %1250  ;;  %v1289_v12 = vmul.f32 %v1359_v6, %v1256_v8 }
 0x9a7   :  { %v1288_v13 = vmul.f32 %v1358_v7, %v1251_v11 }
 0x9a9   :  { %v1296_v30 = vadd.f32 %v1289_v12, %v1288_v13 }
 0x9aa   :  { %v1261_v22 = vpop.permute.xlu1 %1260  ;;  %v1266_v24 = vpop.permute.xlu0 %1265 }
 0x9ab   :  { %v1290_v54 = vmul.f32 %v1360_v17, %v1261_v22  ;;  %v1291_v38 = vmul.f32 %v1361_v23, %v1266_v24 }
 0x9ad   :  { %v1297_v37 = vadd.f32 %v1296_v30, %v1290_v54 }
 0x9ae   :  { %v1271_v57 = vpop.permute.xlu1 %1270  ;;  %v1276_v40 = vpop.permute.xlu0 %1275 }
 0x9af   :  { %v1298_v41 = vadd.f32 %v1297_v37, %v1291_v38  ;;  %v1292_v42 = vmul.f32 %v1362_v33, %v1271_v57  ;;  %v1293_v44 = vmul.f32 %v1363_v39, %v1276_v40 }
 0x9b1   :  { %v1299_v55 = vadd.f32 %v1298_v41, %v1292_v42 }
 0x9b2   :  { %v1281_v45 = vpop.permute.xlu1 %1280  ;;  %v1286_v26 = vpop.permute.xlu0 %1285 }
 0x9b3   :  { %v1300_v60 = vadd.f32 %v1299_v55, %v1293_v44  ;;  %v1294_v46 = vmul.f32 %v1364_v43, %v1281_v45  ;;  %v1295_v50 = vmul.f32 %v1365_v25, %v1286_v26 }
 0x9b5   :  { %v1301_v49 = vadd.f32 %v1300_v60, %v1294_v46 }
 0x9b7   :  { %v1302_v16 = vadd.f32 %v1301_v49, %v1295_v50 }
 0x9b9   :  { %v1303_v51 = vrot.slane %v1302_v16, 4 }
 0x9bb   :  { %v1304_v28 = vadd.f32 %v1303_v51, %v1302_v16 }
 0x9bd   :  { %v1305_v52 = vrot.slane %v1304_v28, 2 }
 0x9bf   :  { %v1306_v10 = vadd.f32 %v1305_v52, %v1304_v28 }
 0x9c1   :  { %v1307_v31 = vrot.slane %v1306_v10, 1 }
 0x9c3   :  { %v1308_v53 = vadd.f32 %v1307_v31, %v1306_v10 }
 0x9c5   :  { %1309 = vst [vmem:[#allocation2] sm:$0x1] %v1308_v53 }
 0x9c6   :  { %1692 = shalt.err (!%p1689_p4)
}
 0x9c7   :  { %s1693_s29 = scalar_lea.hbm %s2135_s10, 16 }
 0x9c8   :  { %p1694_p5 = scmp.ne.s32.totalorder %s2135_s10, %s1693_s29  ;;  %p1697_p6 = scmp.lt.u32.totalorder %s1693_s29, %s2135_s10 }
 0x9ca   :  { %p1699_p7 = pnand %p1697_p6, %p1694_p5 }
 0x9cc   :  { %1702 = shalt.err (!%p1699_p7)
}
 0x9cd   :  { %1319 = dma.vmem_to_hbm [thread:$0]  %s1317_s25, 16, %s2135_s10, [#allocation3]  }
 0x9ce   :  { %1703 = dma.done.wait [#allocation3], 16  }
 0x9cf   :  { %1704 = vsyncadd [#allocation3], 4294967280 }
 0x9d0   :  { %1323 = vsyncpa [#allocation3], 1 }

</bundles_post_ra>
